<compile_context>
chip_gen: v7x
topology: tpu7x:2x2x1
jax: 0.10.0
libtpu: 0.0.40
codegen_flags: <defaults>
</compile_context>

<pallas_src>
import functools

import jax
import jax.numpy as jnp
from jax.experimental import pallas as pl
from jax.experimental.pallas import tpu as pltpu

SOFTARGMAX_TEMPERATURE = 1e-4
_SUBLANE = 8


def _cdiv(a, b):
    return -(-a // b)


def _global_mask_kernel(mask_ref, samp_ref, out_ref, gm_ref, *, bf16_native):
    # mask_ref : (1, 2, TH, W)  learned parameter tile
    # samp_ref : (1, C, TH, W)  sampler_from tile
    # out_ref  : (1, C, TH, W)  sample_out tile
    # gm_ref   : (1, 1, TH, W)  global-mask tile (f32)
    x0 = mask_ref[0, 0].astype(jnp.float32)
    x1 = mask_ref[0, 1].astype(jnp.float32)

    # softmax -> T=1e-4 soft-argmax over 2 channels collapses exactly to
    # sigmoid(tanh((x1-x0)/2)/T) ≈ sigmoid((x1-x0)/(2T)); written via the
    # identity sigmoid(z) = 0.5*tanh(z/2) + 0.5 (single EUP op, stable for
    # arbitrarily large |z|).
    z_half = (x1 - x0) * jnp.float32(0.25 / SOFTARGMAX_TEMPERATURE)
    gm = jnp.tanh(z_half) * jnp.float32(0.5) + jnp.float32(0.5)

    gm_ref[0, 0] = gm.astype(gm_ref.dtype)

    samp = samp_ref[0]                                   # (C, TH, W)
    if bf16_native and samp.dtype == jnp.bfloat16:
        # native bf16 VPU path (v6e / v7x): skip the widen/narrow casts
        out_ref[0] = gm.astype(jnp.bfloat16)[None] * samp
    else:
        out_ref[0] = (gm[None] * samp.astype(jnp.float32)).astype(out_ref.dtype)


_CHIP_PARAMS = None


def _chip_params():
    """(per-step HBM byte target, double-buffered VMEM budget, vmem_limit_bytes,
    native-bf16-VPU) derived once from the local chip generation."""
    global _CHIP_PARAMS
    if _CHIP_PARAMS is not None:
        return _CHIP_PARAMS
    kind = ""
    try:
        kind = jax.devices()[0].device_kind.lower()
    except Exception:
        pass
    vmem_cap = None
    try:
        vmem_cap = int(getattr(pltpu.get_tpu_info(), "vmem_capacity_bytes"))
    except Exception:
        pass
    small_vmem = (vmem_cap is not None and vmem_cap <= 64 * 1024 * 1024) \
        or ("v7" in kind) or ("7x" in kind)
    is_v5e = ("v5 lite" in kind) or ("v5e" in kind) or ("v5lite" in kind)
    if small_vmem:
        # v7x-class: only 64 MiB VMEM/TC but ~3.2 TB/s HBM -> bigger per-step
        # DMA to amortize the ~0.35 us/step overhead, tighter VMEM cap.
        params = (10 * 1024 * 1024, 20 * 1024 * 1024, 40 * 1024 * 1024, True)
    else:
        # v5e / v6e class: 128 MiB VMEM, 0.8-1.4 TB/s HBM.
        params = (3 * 1024 * 1024, 28 * 1024 * 1024, 48 * 1024 * 1024, not is_v5e)
    _CHIP_PARAMS = params
    return params


def _pick_tile_h(H, W, C, samp_itemsize, *, step_bytes, vmem_budget, min_steps):
    """Rows per grid step: a multiple of 8 (or full H) sized so one step moves
    ~step_bytes of HBM traffic, the double-buffered working set fits
    `vmem_budget`, and at least `min_steps` steps remain along H."""
    if H <= _SUBLANE:
        return H
    # per row: 2-channel mask + gm in f32, sampler + output in their dtype
    bytes_per_row = W * (3 * 4 + 2 * C * samp_itemsize)
    th = (step_bytes // bytes_per_row) // _SUBLANE * _SUBLANE
    th_vmem = (vmem_budget // (2 * bytes_per_row)) // _SUBLANE * _SUBLANE
    th = max(_SUBLANE, min(th, th_vmem))
    while th > _SUBLANE and _cdiv(H, th) < min_steps:
        th -= _SUBLANE
    if th >= H:
        th = H                       # full-extent block is always legal
    return int(th)


@jax.jit
def global_mask_forward(global_mask_param, sampler_from):
    """global_mask_param: (B, 2, H, W); sampler_from: (B, C, H, W)."""
    B, two, H, W = global_mask_param.shape
    assert two == 2
    Bs, C, Hs, Ws = sampler_from.shape
    assert (Bs, Hs, Ws) == (B, H, W)

    step_bytes, vmem_budget, vmem_limit, bf16_native = _chip_params()
    # >= 4 total grid steps so both v7x TensorCores get >= 2 pipelined steps.
    min_steps_h = max(1, _cdiv(4, B))
    TH = _pick_tile_h(H, W, C, jnp.dtype(sampler_from.dtype).itemsize,
                      step_bytes=step_bytes, vmem_budget=vmem_budget,
                      min_steps=min_steps_h)
    grid = (B, _cdiv(H, TH))

    kernel = functools.partial(_global_mask_kernel, bf16_native=bf16_native)

    out, gm = pl.pallas_call(
        kernel,
        out_shape=(
            jax.ShapeDtypeStruct((B, C, H, W), sampler_from.dtype),
            jax.ShapeDtypeStruct((B, 1, H, W), jnp.float32),
        ),
        grid_spec=pltpu.PrefetchScalarGridSpec(
            num_scalar_prefetch=0,
            grid=grid,
            in_specs=[
                pl.BlockSpec((1, 2, TH, W), lambda b, t: (b, 0, t, 0)),
                pl.BlockSpec((1, C, TH, W), lambda b, t: (b, 0, t, 0)),
            ],
            out_specs=[
                pl.BlockSpec((1, C, TH, W), lambda b, t: (b, 0, t, 0)),
                pl.BlockSpec((1, 1, TH, W), lambda b, t: (b, 0, t, 0)),
            ],
        ),
        compiler_params=pltpu.CompilerParams(
            dimension_semantics=("parallel", "parallel"),
            vmem_limit_bytes=vmem_limit,
        ),
    )(global_mask_param, sampler_from)

    # Matches the PyTorch forward return: (sample_out, None, global_mask_relu)
    return out, None, gm


def init_global_mask_param(key, batch_size, H, W):
    """Deterministic stand-in for kaiming_normal_(mode='fan_out', relu) applied
    to two (B,1,H,W) tensors, concatenated along dim=1 -> (B,2,H,W)."""
    fan_out = batch_size * H * W
    std = jnp.sqrt(2.0) / jnp.sqrt(fan_out)
    kw, ku = jax.random.split(key)
    w = jax.random.normal(kw, (batch_size, 1, H, W), jnp.float32) * std
    u = jax.random.normal(ku, (batch_size, 1, H, W), jnp.float32) * std
    return jnp.concatenate([w, u], axis=1)


def _reference_forward(param, sampler_from):
    # Literal transcription of the PyTorch forward (softmax -> temperature
    # soft-argmax over the 2-channel dim).
    p = jax.nn.softmax(param, axis=1)
    q = jax.nn.softmax(p / SOFTARGMAX_TEMPERATURE, axis=1)
    idx = jnp.arange(2, dtype=jnp.float32).reshape(1, 2, 1, 1)
    gm = jnp.sum(q * idx, axis=1, keepdims=True)          # (B,1,H,W)
    return gm * sampler_from, gm


if __name__ == "__main__":
    # Small synthetic shapes (the module's real H/W are 256x1216 or 400x640).
    # Second case exercises the ragged path (H not a multiple of TH, W < 128).
    key = jax.random.PRNGKey(0)
    for (B, C, H, W) in [(2, 4, 16, 128), (1, 3, 20, 96)]:
        k_param, k_samp, key = jax.random.split(key, 3)
        param = init_global_mask_param(k_param, B, H, W)
        sampler_from = jax.random.normal(k_samp, (B, C, H, W), jnp.float32)

        sample_out, none_out, gm = global_mask_forward(param, sampler_from)
        jax.block_until_ready((sample_out, gm))

        ref_out, ref_gm = _reference_forward(param, sampler_from)

        assert none_out is None
        assert gm.shape == (B, 1, H, W)
        assert sample_out.shape == (B, C, H, W)
        # Tolerance note: the 1e-4-temperature soft-argmax amplifies f32
        # rounding of the first softmax by 1/T = 1e4 before the final sigmoid,
        # so any two f32 implementations can legitimately differ by O(1e-3) at
        # pixels near the x0 == x1 decision boundary (elsewhere gm is saturated
        # at 0/1 and matches to float precision).
        gm_err = float(jnp.max(jnp.abs(gm - ref_gm)))
        out_err = float(jnp.max(jnp.abs(sample_out - ref_out)))
        assert gm_err < 1e-2, (B, C, H, W, gm_err)
        assert out_err < 5e-2, (B, C, H, W, out_err)

    print("KERNEL_OK")
</pallas_src>

<mosaic_0001>
module attributes {stable_mosaic.version = 11 : i64} {
  func.func @_global_mask_kernel(%arg0: i32, %arg1: i32, %arg2: memref<1x2x8x128xf32, #tpu.memory_space<vmem>>, %arg3: memref<1x4x8x128xf32, #tpu.memory_space<vmem>>, %arg4: memref<1x4x8x128xf32, #tpu.memory_space<vmem>>, %arg5: memref<1x1x8x128xf32, #tpu.memory_space<vmem>>) attributes {dimension_semantics = [#tpu.dimension_semantics<parallel>, #tpu.dimension_semantics<parallel>], iteration_bounds = array<i64: 2, 2>, scalar_prefetch = 0 : i64, scratch_operands = 0 : i64, tpu.core_type = #tpu.core_type<tc>, window_params = [{transform_indices = @transform_0, window_bounds = array<i64: 1, 2, 8, 128>}, {transform_indices = @transform_1, window_bounds = array<i64: 1, 4, 8, 128>}, {transform_indices = @transform_2, window_bounds = array<i64: 1, 4, 8, 128>}, {transform_indices = @transform_3, window_bounds = array<i64: 1, 1, 8, 128>}]} {
    %c0 = arith.constant 0 : index
    %c0_0 = arith.constant 0 : index
    %c0_1 = arith.constant 0 : index
    %c0_2 = arith.constant 0 : index
    %0 = vector.load %arg2[%c0, %c0_0, %c0_1, %c0_2] : memref<1x2x8x128xf32, #tpu.memory_space<vmem>>, vector<1x1x8x128xf32>
    %1 = vector.shape_cast %0 : vector<1x1x8x128xf32> to vector<8x128xf32>
    %c0_3 = arith.constant 0 : index
    %c1 = arith.constant 1 : index
    %c0_4 = arith.constant 0 : index
    %c0_5 = arith.constant 0 : index
    %2 = vector.load %arg2[%c0_3, %c1, %c0_4, %c0_5] : memref<1x2x8x128xf32, #tpu.memory_space<vmem>>, vector<1x1x8x128xf32>
    %3 = vector.shape_cast %2 : vector<1x1x8x128xf32> to vector<8x128xf32>
    %4 = arith.subf %3, %1 : vector<8x128xf32>
    %cst = arith.constant 2.500000e+03 : f32
    %5 = vector.broadcast %cst : f32 to vector<8x128xf32>
    %6 = arith.mulf %4, %5 : vector<8x128xf32>
    %7 = math.tanh %6 : vector<8x128xf32>
    %cst_6 = arith.constant 5.000000e-01 : f32
    %8 = vector.broadcast %cst_6 : f32 to vector<8x128xf32>
    %9 = arith.mulf %7, %8 : vector<8x128xf32>
    %cst_7 = arith.constant 5.000000e-01 : f32
    %10 = vector.broadcast %cst_7 : f32 to vector<8x128xf32>
    %11 = arith.addf %9, %10 : vector<8x128xf32>
    %c0_8 = arith.constant 0 : index
    %c0_9 = arith.constant 0 : index
    %c0_10 = arith.constant 0 : index
    %c0_11 = arith.constant 0 : index
    %12 = vector.load %arg5[%c0_8, %c0_9, %c0_10, %c0_11] : memref<1x1x8x128xf32, #tpu.memory_space<vmem>>, vector<1x1x8x128xf32>
    %13 = vector.shape_cast %12 : vector<1x1x8x128xf32> to vector<8x128xf32>
    %14 = vector.shape_cast %11 : vector<8x128xf32> to vector<1x1x8x128xf32>
    tpu.vector_store %arg5[%c0_8, %c0_9, %c0_10, %c0_11], %14 {strides = array<i32>} : memref<1x1x8x128xf32, #tpu.memory_space<vmem>>, vector<1x1x8x128xf32>,
    %c0_12 = arith.constant 0 : index
    %c0_13 = arith.constant 0 : index
    %c0_14 = arith.constant 0 : index
    %c0_15 = arith.constant 0 : index
    %15 = vector.load %arg3[%c0_12, %c0_13, %c0_14, %c0_15] : memref<1x4x8x128xf32, #tpu.memory_space<vmem>>, vector<1x4x8x128xf32>
    %16 = vector.shape_cast %15 : vector<1x4x8x128xf32> to vector<4x8x128xf32>
    %17 = vector.shape_cast %11 : vector<8x128xf32> to vector<1x8x128xf32>
    %18 = vector.broadcast %17 : vector<1x8x128xf32> to vector<4x8x128xf32>
    %19 = arith.mulf %18, %16 : vector<4x8x128xf32>
    %c0_16 = arith.constant 0 : index
    %c0_17 = arith.constant 0 : index
    %c0_18 = arith.constant 0 : index
    %c0_19 = arith.constant 0 : index
    %20 = vector.load %arg4[%c0_16, %c0_17, %c0_18, %c0_19] : memref<1x4x8x128xf32, #tpu.memory_space<vmem>>, vector<1x4x8x128xf32>
    %21 = vector.shape_cast %20 : vector<1x4x8x128xf32> to vector<4x8x128xf32>
    %22 = vector.shape_cast %19 : vector<4x8x128xf32> to vector<1x4x8x128xf32>
    tpu.vector_store %arg4[%c0_16, %c0_17, %c0_18, %c0_19], %22 {strides = array<i32>} : memref<1x4x8x128xf32, #tpu.memory_space<vmem>>, vector<1x4x8x128xf32>,
    return
  }
  func.func @transform_0(%arg0: i32, %arg1: i32) -> (i32, i32, i32, i32) {
    %c0_i32 = arith.constant 0 : i32
    %c0_i32_0 = arith.constant 0 : i32
    %c0_i32_1 = arith.constant 0 : i32
    return %arg0, %c0_i32, %arg1, %c0_i32_0 : i32, i32, i32, i32
  }
  func.func @transform_1(%arg0: i32, %arg1: i32) -> (i32, i32, i32, i32) {
    %c0_i32 = arith.constant 0 : i32
    %c0_i32_0 = arith.constant 0 : i32
    %c0_i32_1 = arith.constant 0 : i32
    return %arg0, %c0_i32, %arg1, %c0_i32_0 : i32, i32, i32, i32
  }
  func.func @transform_2(%arg0: i32, %arg1: i32) -> (i32, i32, i32, i32) {
    %c0_i32 = arith.constant 0 : i32
    %c0_i32_0 = arith.constant 0 : i32
    %c0_i32_1 = arith.constant 0 : i32
    return %arg0, %c0_i32, %arg1, %c0_i32_0 : i32, i32, i32, i32
  }
  func.func @transform_3(%arg0: i32, %arg1: i32) -> (i32, i32, i32, i32) {
    %c0_i32 = arith.constant 0 : i32
    %c0_i32_0 = arith.constant 0 : i32
    %c0_i32_1 = arith.constant 0 : i32
    return %arg0, %c0_i32, %arg1, %c0_i32_0 : i32, i32, i32, i32
  }
}

</mosaic_0001>

<bundles_post_ra>
// kernel: global_mask_forward.1
= control target key start
LH: loop header
LB: loop body
LE: loop exit
PB: predicated region body
PF: predicated region fallthrough
CT: control target
= control target key end

     0   :  { %s1102_s0 = inlined_call_operand.hbm [shape: f32[2,2,16,128], index: 0, kind: input, shape index: {}]   ;;  %s1103_s1 = inlined_call_operand.hbm [shape: f32[2,4,16,128], index: 1, kind: input, shape index: {}]   ;;  %s1104_s2 = inlined_call_operand.hbm [shape: f32[2,4,16,128], index: 2, kind: output, shape index: {0}]   ;;  %s1105_s3 = inlined_call_operand.hbm [shape: f32[2,1,16,128], index: 3, kind: output, shape index: {1}]  }
   0x1   :  { %1111 = sst [smem:[#allocation18_spill]] %s1102_s0 }
   0x2   :  { %9 = vsyncpa [#allocation3], 0 }
   0x3   :  { %11 = vsyncpa [#allocation3 + $0x1], 0 }
   0x4   :  { %12 = vsyncpa [#allocation6], 0 }
   0x5   :  { %14 = vsyncpa [#allocation6 + $0x1], 0 }
   0x6   :  { %15 = vsyncpa [#allocation4], 0 }
   0x7   :  { %17 = vsyncpa [#allocation4 + $0x1], 0 }
   0x8   :  { %18 = vsyncpa [#allocation9], 0 }
   0x9   :  { %20 = vsyncpa [#allocation9 + $0x1], 0  ;;  %s811_s12 = smov 0   ;;  %s813_s13 = smov 0  }
   0xa   :  { %s815_s14 = smov 0   ;;  %s817_s15 = smov 0  }
   0xb   :  { %s819_s16 = smov 0   ;;  %s821_s17 = smov 0  }
   0xc   :  { %s823_s18 = smov 0   ;;  %s825_s19 = smov 0  }
   0xd LB: > { %1112 = sst [smem:[#allocation14_spill]] %s759_s14  ;;  %s465_s20 = sadd.s32 4294967295, %s779_s19   ;;  %s779_s19 = sphi %s825_s19, %s26_s19   ;;  %s775_s18 = sphi %s823_s18, %s1135_s18   ;;  %s771_s17 = sphi %s821_s17, %s1134_s17   ;;  %s767_s16 = sphi %s819_s16, %s1133_s16   ;;  %s763_s15 = sphi %s817_s15, %s1132_s15   ;;  %s759_s14 = sphi %s815_s14, %s1127_s14   ;;  %s755_s13 = sphi %s813_s13, %s1131_s13   ;;  %s751_s12 = sphi %s811_s12, %s1130_s12  }
   0xe   : > { %s466_s21 = sadd.s32 4294967294, %s779_s19   ;;  %s35_s22 = sadd.s32 1, %s771_s17 }
   0xf   : > { %s38_s23 = sadd.s32 1, %s775_s18  ;;  %p36_p0 = scmp.ge.s32.totalorder %s35_s22, 2 }
  0x10   : > { %s47_s24 = sadd.s32 1, %s759_s14  ;;  %p54_p1 = scmp.ne.s32.totalorder %s759_s14, %s755_s13 }
  0x11   : > { %p55_p2 = scmp.eq.s32.totalorder %s779_s19, 0  ;;  %s1137_s22 = smov (%p36_p0, %s35_s22), 0 }
  0x12   : > { %1113 = sst [smem:[#allocation15_spill]] %s1137_s22  ;;  %s1139_s23 = smov (!%p36_p0, %s38_s23), %s775_s18 }
  0x13   : > { %s43_s25 = ssub.s32 %s771_s17, %s1137_s22  ;;  %p864_p3 = por %p55_p2, %p54_p1 }
  0x14   : > { %p40_p4 = scmp.ge.s32.totalorder %s1139_s23, 2  ;;  %p60_p5 = scmp.ne.s32.totalorder %s755_s13, %s751_s12 }
  0x15   : > { %p61_p6 = scmp.eq.s32.totalorder %s465_s20, 0  ;;  %p114_p7 = scmp.eq.s32.totalorder %s465_s20, 3 }
  0x16   : > { %s1141_s23 = smov (%p40_p4, %s1139_s23), 0  ;;  %p120_p10 = scmp.eq.s32.totalorder %s466_s21, 3 }
  0x17   : > { %1115 = sst [smem:[#allocation16_spill]] %s1141_s23  ;;  %p872_p8 = por %p61_p6, %p60_p5 }
  0x18   : > { %p876_p9 = por %p114_p7, %p54_p1  ;;  %s42_s29 = ssub.s32 %s775_s18, %s1141_s23 }
  0x19   : > { %s1116_s27 = scalar_select %p872_p8, 1, 0 }
  0x1a   : > { %s1117_s28 = scalar_select %p876_p9, 1, 0 }
  0x1b   : > { %s44_s30 = sor.u32 %s43_s25, %s42_s29  ;;  %p882_p12 = por %p120_p10, %p60_p5 }
  0x1c   : > { %p45_p11 = scmp.eq.s32.totalorder %s44_s30, 0  ;;  %p511_p13 = scmp.lt.s32.totalorder %s779_s19, 4 }
  0x1d   : > { %s1118_s4 = scalar_select %p882_p12, 1, 0 }
  0x1e   : > { %s888_s5 = sand.u32 1, %s759_s14   ;;  %s470_s8 = sshll.u32 %s775_s18, 2 }
  0x1f   : > { %s891_s6 = scalar_select %p45_p11, %s759_s14, %s47_s24  }
  0x20   : > { %s469_s7 = sshll.u32 %s888_s5, 4  ;;  %s177_s9 = sadd.s32 %s771_s17, %s470_s8 }
  0x21   : > { %1119 = sst [smem:[#allocation17_spill]] %s891_s6  ;;  %s172_s10 = scalar_lea.vmem [#allocation2], %s469_s7 }
  0x22   : > { %s180_s11 = sshll.u32 %s172_s10, 4  ;;  %s471_s20 = sshll.u32 %s177_s9, 7  ;;  %s896_s11 = int_to_ptr.vmem [resolvable:$true] %s180_s11 }
  0x23   : > { %s1120_s0 = sld [smem:[#allocation18_spill]]  ;;  %p905_p0 = pnand %p511_p13, %p864_p3 }
  0x24   : > { %s169_s30 = scalar_lea.sflag [#allocation3], %s888_s5 }
  0x25   : > { %p587_p2 = pneg %p905_p0 }
  0x29   : > { %s901_s29 = scalar_lea.hbm %s1120_s0, %s471_s20  ;;  %s590_s9 = scalar_lea.hbm %s1120_s0, 1024 }
  0x2a   : > { %s585_s7 = scalar_lea.hbm %s901_s29, 256  ;;  %p591_p3 = scmp.lt.u32.totalorder %s901_s29, %s1120_s0 }
  0x2b   : > { %p586_p1 = scmp.ne.s32.totalorder %s901_s29, %s585_s7  ;;  %p592_p6 = scmp.lt.u32.totalorder %s590_s9, %s585_s7 }
  0x2c   : > { %p594_p10 = scmp.lt.u32.totalorder %s585_s7, %s901_s29 }
  0x2d   : > { %p588_p4 = pnand %p587_p2, %p586_p1  ;;  %p593_p7 = por %p592_p6, %p591_p3 }
  0x2f   : > { %p589_p5 = pneg %p588_p4  ;;  %p595_p11 = por %p594_p10, %p593_p7 }
  0x31   : > { %p596_p13 = pnand %p595_p11, %p589_p5 }
  0x33   : > { %599 = shalt.err (!%p596_p13)
}
  0x34   : > { %s600_s21 = scalar_lea.vmem %s896_s11, 256  ;;  %s781_s25 = smov [#allocation2]  }
  0x35   : > { %p601_p1 = scmp.ne.s32.totalorder %s896_s11, %s600_s21  ;;  %s605_s26 = sshll.u32 %s781_s25, 4  ;;  %s606_s26 = int_to_ptr.vmem [resolvable:$false] %s605_s26 }
  0x36   : > { %s607_s8 = scalar_lea.vmem %s606_s26, 512  ;;  %p608_p9 = scmp.lt.s32.totalorder %s896_s11, %s606_s26 }
  0x37   : > { %p603_p4 = pnand %p601_p1, %p587_p2  ;;  %p609_p3 = scmp.lt.s32.totalorder %s607_s8, %s600_s21 }
  0x39   : > { %p604_p12 = pneg %p603_p4  ;;  %p610_p6 = por %p609_p3, %p608_p9 }
  0x3b   : > { %p611_p7 = pnand %p610_p6, %p604_p12 }
  0x3d   : > { %614 = shalt.err (!%p611_p7)
}
  0x3e   : > { %s782_s7 = smov 256   ;;  %s783_s9 = smov 128  }
  0x3f   : > { %s784_s10 = smov 8   ;;  %p475_p9 = scmp.ge.s32.totalorder %s779_s19, 1 }
  0x40   : > { %500 = dma.hbm_to_vmem [thread:$0]  (!%p905_p0), %s901_s29, 256, %s896_s11, %s169_s30, %s782_s7, %s783_s9, %s784_s10  }
  0x41   : > { %p210_p12 = scmp.lt.s32.totalorder %s779_s19, 5  ;;  %s472_s20 = sshll.u32 %s888_s5, 5 }
  0x42   : > { %s473_s25 = sshll.u32 %s775_s18, 3  ;;  %s194_s26 = scalar_lea.vmem [#allocation5], %s472_s20 }
  0x43   : > { %p943_p5 = pnand %p475_p9, %p210_p12  ;;  %s202_s8 = sshll.u32 %s194_s26, 4  ;;  %s949_s8 = int_to_ptr.vmem [resolvable:$true] %s202_s8 }
  0x44   : > { %s199_s0 = sadd.s32 %s771_s17, %s473_s25  ;;  %s191_s11 = scalar_lea.sflag [#allocation6], %s888_s5 }
  0x45   : > { %s474_s23 = sshll.u32 %s199_s0, 7  ;;  %s620_s0 = scalar_lea.hbm %s1103_s1, 2048 }
  0x46   : > { %s954_s14 = scalar_lea.hbm %s1103_s1, %s474_s23 }
  0x47   : > { %s615_s29 = scalar_lea.hbm %s954_s14, 512  ;;  %p621_p1 = scmp.lt.u32.totalorder %s954_s14, %s1103_s1 }
  0x48   : > { %p616_p10 = scmp.ne.s32.totalorder %s954_s14, %s615_s29  ;;  %p622_p4 = scmp.lt.u32.totalorder %s620_s0, %s615_s29 }
  0x49   : > { %p624_p6 = scmp.lt.u32.totalorder %s615_s29, %s954_s14 }
  0x4a   : > { %p618_p11 = pnand %p616_p10, %p587_p2  ;;  %p623_p3 = por %p622_p4, %p621_p1 }
  0x4c   : > { %p619_p13 = pneg %p618_p11  ;;  %p625_p7 = por %p624_p6, %p623_p3 }
  0x4e   : > { %p626_p9 = pnand %p625_p7, %p619_p13 }
  0x50   : > { %629 = shalt.err (!%p626_p9)
}
  0x51   : > { %s630_s22 = scalar_lea.vmem %s949_s8, 512  ;;  %s785_s23 = smov [#allocation5]  }
  0x52   : > { %p631_p12 = scmp.ne.s32.totalorder %s949_s8, %s630_s22  ;;  %s635_s6 = sshll.u32 %s785_s23, 4  ;;  %s636_s6 = int_to_ptr.vmem [resolvable:$false] %s635_s6 }
  0x53   : > { %s637_s30 = scalar_lea.vmem %s636_s6, 1024  ;;  %p638_p8 = scmp.lt.s32.totalorder %s949_s8, %s636_s6 }
  0x54   : > { %p633_p10 = pnand %p631_p12, %p587_p2  ;;  %p639_p1 = scmp.lt.s32.totalorder %s637_s30, %s630_s22 }
  0x56   : > { %p634_p11 = pneg %p633_p10  ;;  %p640_p4 = por %p639_p1, %p638_p8 }
  0x58   : > { %p641_p3 = pnand %p640_p4, %p634_p11 }
  0x5a   : > { %644 = shalt.err (!%p641_p3)
}
  0x5b   : > { %503 = dma.hbm_to_vmem [thread:$0]  (!%p905_p0), %s954_s14, 512, %s949_s8, %s191_s11, %s782_s7, %s783_s9, %s784_s10  }
  0x5c   : > { %214 = sbr.rel (%p943_p5) target bundleno = 162 (0xa2), region = 28  ;;  %s988_s29 = sand.u32 (!%p943_p5), 1, %s755_s13  }
  0x5d   : > { %s476_s20 = sshll.u32 (!%p943_p5), %s988_s29, 4  ;;  %s217_s0 = scalar_lea.sflag (!%p943_p5), [#allocation3], %s988_s29 }
  0x5e   : > { %s220_s24 = scalar_lea.vmem (!%p943_p5), [#allocation2], %s476_s20  ;;  %p1123_p8 = scmp.ne.s32.totalorder (!%p943_p5), %s1116_s27, 0 }
  0x63   : > { %734 = dma.done.wait (%p1123_p8), %s217_s0, 256  }
  0x64   : > { %736 = vsyncadd (%p1123_p8), %s217_s0, 4294967040  ;;  %s477_s14 = sshll.u32 %s988_s29, 5  ;;  %s226_s5 = scalar_lea.sflag [#allocation6], %s988_s29 }
  0x65   : > { %s229_s7 = scalar_lea.vmem [#allocation5], %s477_s14 }
  0x66   : > { %738 = dma.done.wait (%p1123_p8), %s226_s5, 512  }
  0x67   : > { %740 = vsyncadd (%p1123_p8), %s226_s5, 4294966784  ;;  %v262_v0 = vld [vmem:[%s220_s24] sm:$0xff]  ;;  %v480_v1 = vld [vmem:[%s220_s24 + $0x8] sm:$0xff]  ;;  %s479_s9 = sshll.u32 %s988_s29, 3  ;;  %s485_s10 = sshll.u32 %s767_s16, 1 }
  0x68   : > { %v265_v2 = vsub.f32 %v480_v1, %v262_v0  ;;  %s483_s21 = sshll.u32 %s767_s16, 3  ;;  %s317_s8 = sadd.s32 %s763_s15, %s485_s10  ;;  %v271_v6 = vld [vmem:[%s229_s7] sm:$0xff]  ;;  %v272_v7 = vld [vmem:[%s229_s7 + $0x8] sm:$0xff]  ;;  %v273_v8 = vld [vmem:[%s229_s7 + $0x10] sm:$0xff] }
  0x69   : > { %s261_s11 = scalar_lea.vmem [#allocation8], %s479_s9  ;;  %s1006_s26 = scalar_lea.vmem [#allocation7], %s477_s14  ;;  %v274_v9 = vld [vmem:[%s229_s7 + $0x18] sm:$0xff] }
  0x6a   : > { %v266_v3 = vmul.f32 2500.0, %v265_v2  ;;  %s321_s25 = sshll.u32 %s261_s11, 4  ;;  %s303_s27 = sshll.u32 %s1006_s26, 4  ;;  %s1010_s25 = int_to_ptr.vmem [resolvable:$true] %s321_s25  ;;  %s1012_s27 = int_to_ptr.vmem [resolvable:$true] %s303_s27 }
  0x6b   : > { %s300_s22 = sadd.s32 %s763_s15, %s483_s21  ;;  %s486_s23 = sshll.u32 %s317_s8, 7 }
  0x6c   : > { %583 = vtanh.f32 %v266_v3  ;;  %s484_s16 = sshll.u32 %s300_s22, 7  ;;  %s1017_s15 = scalar_lea.hbm %s1105_s3, %s486_s23 }
  0x6d   : > { %s1022_s24 = scalar_lea.hbm %s1104_s2, %s484_s16  ;;  %s289_s14 = scalar_lea.sflag [#allocation9], %s988_s29 }
  0x6e   : > { %s645_s5 = scalar_lea.vmem %s1010_s25, 128  ;;  %p1124_p2 = scmp.ne.s32.totalorder %s1117_s28, 0 }
  0x6f   : > { %p646_p0 = scmp.ne.s32.totalorder %s1010_s25, %s645_s5  ;;  %s786_s7 = smov [#allocation8]  }
  0x70   : > { %s649_s9 = sshll.u32 %s786_s7, 4  ;;  %s650_s9 = int_to_ptr.vmem [resolvable:$false] %s649_s9 }
  0x71   : > { %p647_p5 = pnand %p646_p0, %p1124_p2  ;;  %s651_s10 = scalar_lea.vmem %s650_s9, 256 }
  0x72   : > { %p652_p6 = scmp.lt.s32.totalorder %s1010_s25, %s650_s9  ;;  %p653_p7 = scmp.lt.s32.totalorder %s651_s10, %s645_s5 }
  0x73   : > { %p648_p13 = pneg %p647_p5 }
  0x74   : > { %p654_p9 = por %p653_p7, %p652_p6 }
  0x76   : > { %v584_v4 = vpop.eup %583  ;;  %p655_p12 = pnand %p654_p9, %p648_p13 }
  0x77   : > { %v268_v5 = vmul.f32 0.5, %v584_v4 }
  0x79   : > { %v269_v10 = vadd.f32 0.5, %v268_v5 }
  0x7b   : > { %270 = vst [vmem:[%s261_s11] sm:$0xff] %v269_v10  ;;  %v275_v11 = vmul.f32 %v271_v6, %v269_v10  ;;  %v276_v12 = vmul.f32 %v272_v7, %v269_v10  ;;  %v277_v13 = vmul.f32 %v273_v8, %v269_v10  ;;  %v278_v14 = vmul.f32 %v274_v9, %v269_v10 }
  0x7c   : > { %658 = shalt.err (!%p655_p12)
}
  0x7d   : > { %s659_s21 = scalar_lea.hbm %s1017_s15, 128  ;;  %s663_s22 = scalar_lea.hbm %s1105_s3, 512 }
  0x7e   : > { %p660_p10 = scmp.ne.s32.totalorder %s1017_s15, %s659_s21  ;;  %p664_p4 = scmp.lt.u32.totalorder %s1017_s15, %s1105_s3 }
  0x7f   : > { %p665_p3 = scmp.lt.u32.totalorder %s663_s22, %s659_s21  ;;  %p667_p0 = scmp.lt.u32.totalorder %s659_s21, %s1017_s15 }
  0x80   : > { %p661_p11 = pnand %p660_p10, %p1124_p2 }
  0x81   : > { %p666_p8 = por %p665_p3, %p664_p4 }
  0x82   : > { %p662_p1 = pneg %p661_p11 }
  0x83   : > { %p668_p5 = por %p667_p0, %p666_p8 }
  0x85   : > { %p669_p13 = pnand %p668_p5, %p662_p1 }
  0x87   : > { %672 = shalt.err (!%p669_p13)
}
  0x88   : > { %494 = dma.vmem_to_hbm [thread:$0]  (%p1124_p2), %s1010_s25, 128, %s1017_s15, %s289_s14   ;;  %279 = vst [vmem:[%s1006_s26] sm:$0xff] %v275_v11  ;;  %280 = vst [vmem:[%s1006_s26 + $0x8] sm:$0xff] %v276_v12 }
  0x89   : > { %281 = vst [vmem:[%s1006_s26 + $0x10] sm:$0xff] %v277_v13  ;;  %282 = vst [vmem:[%s1006_s26 + $0x18] sm:$0xff] %v278_v14  ;;  %s284_s6 = scalar_lea.sflag [#allocation4], %s988_s29  ;;  %s673_s30 = scalar_lea.vmem %s1012_s27, 512 }
  0x8a   : > { %p674_p6 = scmp.ne.s32.totalorder %s1012_s27, %s673_s30  ;;  %s787_s20 = smov [#allocation7]  }
  0x8b   : > { %s677_s0 = sshll.u32 %s787_s20, 4  ;;  %s678_s0 = int_to_ptr.vmem [resolvable:$false] %s677_s0 }
  0x8c   : > { %p675_p7 = pnand %p674_p6, %p1124_p2  ;;  %s679_s5 = scalar_lea.vmem %s678_s0, 1024 }
  0x8d   : > { %p680_p12 = scmp.lt.s32.totalorder %s1012_s27, %s678_s0  ;;  %p681_p10 = scmp.lt.s32.totalorder %s679_s5, %s673_s30 }
  0x8e   : > { %p676_p9 = pneg %p675_p7 }
  0x8f   : > { %p682_p11 = por %p681_p10, %p680_p12 }
  0x91   : > { %p683_p1 = pnand %p682_p11, %p676_p9 }
  0x93   : > { %686 = shalt.err (!%p683_p1)
}
  0x94   : > { %s687_s25 = scalar_lea.hbm %s1022_s24, 512  ;;  %s691_s14 = scalar_lea.hbm %s1104_s2, 2048 }
  0x95   : > { %p688_p4 = scmp.ne.s32.totalorder %s1022_s24, %s687_s25  ;;  %p692_p0 = scmp.lt.u32.totalorder %s1022_s24, %s1104_s2 }
  0x96   : > { %p693_p5 = scmp.lt.u32.totalorder %s691_s14, %s687_s25  ;;  %p695_p6 = scmp.lt.u32.totalorder %s687_s25, %s1022_s24 }
  0x97   : > { %p689_p3 = pnand %p688_p4, %p1124_p2 }
  0x98   : > { %p694_p13 = por %p693_p5, %p692_p0 }
  0x99   : > { %p690_p8 = pneg %p689_p3 }
  0x9a   : > { %p696_p7 = por %p695_p6, %p694_p13 }
  0x9c   : > { %p697_p9 = pnand %p696_p7, %p690_p8 }
  0x9e   : > { %700 = shalt.err (!%p697_p9)
}
  0x9f   : > { %s788_s10 = smov 128   ;;  %s789_s21 = smov 256  }
  0xa0   : > { %s790_s8 = smov 8  }
  0xa1   : > { %493 = dma.vmem_to_hbm [thread:$0]  (%p1124_p2), %s1012_s27, 512, %s1022_s24, %s284_s6, %s788_s10, %s789_s21, %s790_s8  }
  0xa2 PF: > { %p512_p12 = scmp.ge.s32.totalorder %s779_s19, 2  ;;  %s333_s11 = sand.u32 1, %s751_s12  }
  0xa3   : > { %p1125_p10 = scmp.ne.s32.totalorder %s1118_s4, 0  ;;  %s334_s22 = scalar_lea.sflag [#allocation4], %s333_s11 }
  0xa5   : > { %p505_p11 = pnand %p512_p12, %p1125_p10 }
  0xa7   : > { %742 = dma.done.wait (!%p505_p11), %s334_s22, 512  }
  0xa8   : > { %744 = vsyncadd (!%p505_p11), %s334_s22, 4294966784  ;;  %s343_s23 = scalar_lea.sflag [#allocation9], %s333_s11 }
  0xa9   : > { %746 = dma.done.wait (!%p505_p11), %s343_s23, 128  }
  0xaa   : > { %748 = vsyncadd (!%p505_p11), %s343_s23, 4294967168  ;;  %s26_s19 = sadd.s32 1, %s779_s19   ;;  %s1126_s28 = sld [smem:[#allocation14_spill]] }
  0xab   : > { %p23_p1 = scmp.ge.s32.totalorder %s26_s19, 6   ;;  %s1127_s14 = sld [smem:[#allocation17_spill]] }
  0xac   : > { %s1128_s29 = sld [smem:[#allocation15_spill]]  ;;  %s1129_s27 = sld [smem:[#allocation16_spill]] }
  0xad   : > { %s1130_s12 = smov %s755_s13  ;;  %s1132_s15 = smov %s771_s17 }
  0xae   : > { %s1133_s16 = smov %s775_s18  ;;  %25 = sbr.rel (!%p23_p1) target bundleno = 13 (0xd), region = 104 }
  0xb0   : > { %s1131_s13 = smov %s1126_s28 }
  0xb2   : > { %s1134_s17 = smov %s1128_s29  ;;  %s1135_s18 = smov %s1129_s27 }
  0xb5   :  { %348 = vsyncpa [#allocation3], 1 }
  0xb6   :  { %350 = vsyncpa [#allocation3 + $0x1], 1 }
  0xb7   :  { %351 = vsyncpa [#allocation6], 1 }
  0xb8   :  { %353 = vsyncpa [#allocation6 + $0x1], 1 }
  0xb9   :  { %354 = vsyncpa [#allocation4], 1 }
  0xba   :  { %356 = vsyncpa [#allocation4 + $0x1], 1 }
  0xbb   :  { %357 = vsyncpa [#allocation9], 1 }
  0xbc   :  { %359 = vsyncpa [#allocation9 + $0x1], 1 }

</bundles_post_ra>
